<compile_context>
chip_gen: v7x
topology: tpu7x:2x2x1
jax: 0.10.0
libtpu: 0.0.40
codegen_flags: <defaults>
</compile_context>

<pallas_src>
import jax
import jax.numpy as jnp
from jax.experimental import pallas as pl
from jax.experimental.pallas import tpu as pltpu


def _round_up(x, m):
    return (x + m - 1) // m * m


def _sensors_out_kernel(x_ref, w_ref, b_ref, o_ref):
    # x: (tile_b, H), w: (H, E_pad), b: (1, E_pad), o: (tile_b, E_pad)
    x = x_ref[...].astype(jnp.float32)
    w = w_ref[...].astype(jnp.float32)

    # Linear: y = x @ W + b   (MXU matmul, f32 accumulation)
    y = jnp.dot(x, w, preferred_element_type=jnp.float32) + b_ref[...].astype(jnp.float32)

    # Tanh on the EUP, then fold (t + 1) / 2 into one scale/shift on the VPU.
    t = jnp.tanh(y)
    o_ref[...] = (t * jnp.float32(0.5) + jnp.float32(0.5)).astype(o_ref.dtype)


def sensors_out_forward(h_w_wheels_joints, params):
    """h_w_wheels_joints: (episodes, steps, H) -> (episodes, steps, sensors_shape)."""
    episodes, steps, h = h_w_wheels_joints.shape
    w, b = params["w"], params["b"]
    e = w.shape[1]
    bsz = episodes * steps

    # model_start "lin": flatten (episodes, steps, H) -> (B, H)
    x2d = h_w_wheels_joints.reshape(bsz, h)

    # Lane-dense output: pad E up to a multiple of 128 (unmasked stores,
    # better MXU N-dim utilization). Padded columns of W/b are zero.
    e_pad = _round_up(e, 128)
    if e_pad != e:
        w_p = jnp.pad(w, ((0, 0), (0, e_pad - e)))
        b_p = jnp.pad(b, ((0, 0), (0, e_pad - e)))
    else:
        w_p, b_p = w, b

    # Batch tiling: <=512 rows per tile, aligned to the 8-sublane grain.
    block_b = 512 if bsz >= 512 else _round_up(bsz, 8)
    bsz_pad = _round_up(bsz, block_b)
    if bsz_pad != bsz:
        x2d_p = jnp.pad(x2d, ((0, bsz_pad - bsz), (0, 0)))
    else:
        x2d_p = x2d
    grid = (bsz_pad // block_b,)

    out2d = pl.pallas_call(
        _sensors_out_kernel,
        out_shape=jax.ShapeDtypeStruct((bsz_pad, e_pad), h_w_wheels_joints.dtype),
        grid=grid,
        in_specs=[
            pl.BlockSpec((block_b, h), lambda i: (i, 0)),   # x tile
            pl.BlockSpec((h, e_pad), lambda i: (0, 0)),     # W (resident)
            pl.BlockSpec((1, e_pad), lambda i: (0, 0)),     # bias (resident)
        ],
        out_specs=pl.BlockSpec((block_b, e_pad), lambda i: (i, 0)),
        compiler_params=pltpu.CompilerParams(
            dimension_semantics=("parallel",),              # v7x: split tiles across TCs
        ),
    )(x2d_p, w_p, b_p)

    # Slice off the lane / batch padding, then model_end "lin" reshape.
    out2d = out2d[:bsz, :e]
    return out2d.reshape(episodes, steps, e)


def init_params(key, h_w_wheels_joints_size, sensors_shape, dtype=jnp.float32):
    """Deterministic synthetic init (stands in for init_weights)."""
    k_w, k_b = jax.random.split(key)
    scale = 1.0 / jnp.sqrt(jnp.float32(h_w_wheels_joints_size))
    w = (jax.random.normal(k_w, (h_w_wheels_joints_size, sensors_shape), jnp.float32)
         * scale).astype(dtype)
    b = (jax.random.normal(k_b, (1, sensors_shape), jnp.float32) * 0.01).astype(dtype)
    return {"w": w, "b": b}


if __name__ == "__main__":
    # Small, forward-consistent shapes:
    #   args.h_w_wheels_joints_size = 32, args.sensors_shape = 16
    episodes, steps, h_size, sensors_shape = 2, 8, 32, 16

    key = jax.random.PRNGKey(0)
    k_x, k_p = jax.random.split(key)
    h_w_wheels_joints = jax.random.normal(k_x, (episodes, steps, h_size), jnp.float32)
    params = init_params(k_p, h_size, sensors_shape)

    # TODO(synk): args.half path (fp16 cast + clip_grad_norm_) and the
    # model_start/model_end timing bookkeeping are training/profiling glue, not ported.
    out = sensors_out_forward(h_w_wheels_joints, params)
    jax.block_until_ready(out)

    # Sanity check against a pure-JAX reference of the same math.
    x2d = h_w_wheels_joints.reshape(-1, h_size)
    y = x2d @ params["w"] + params["b"]
    ref = ((jnp.tanh(y) + 1.0) / 2.0).reshape(episodes, steps, sensors_shape)
    assert jnp.allclose(out, ref, atol=1e-5, rtol=1e-5), "mismatch vs reference"

    print("KERNEL_OK")
</pallas_src>

<mosaic_0001>
module attributes {stable_mosaic.version = 11 : i64} {
  func.func @_sensors_out_kernel(%arg0: i32, %arg1: memref<16x32xf32, #tpu.memory_space<vmem>>, %arg2: memref<32x128xf32, #tpu.memory_space<vmem>>, %arg3: memref<1x128xf32, #tpu.memory_space<vmem>>, %arg4: memref<16x128xf32, #tpu.memory_space<vmem>>) attributes {dimension_semantics = [#tpu.dimension_semantics<parallel>], iteration_bounds = array<i64: 1>, scalar_prefetch = 0 : i64, scratch_operands = 0 : i64, tpu.core_type = #tpu.core_type<tc>, window_params = [{transform_indices = @transform_0, window_bounds = array<i64: 16, 32>}, {pipeline_mode = #tpu.pipeline_mode<synchronous>, transform_indices = @transform_1, window_bounds = array<i64: 32, 128>}, {pipeline_mode = #tpu.pipeline_mode<synchronous>, transform_indices = @transform_2, window_bounds = array<i64: 1, 128>}, {transform_indices = @transform_3, window_bounds = array<i64: 16, 128>}]} {
    %c0 = arith.constant 0 : index
    %c0_0 = arith.constant 0 : index
    %0 = vector.load %arg1[%c0, %c0_0] : memref<16x32xf32, #tpu.memory_space<vmem>>, vector<16x32xf32>
    %c0_1 = arith.constant 0 : index
    %c0_2 = arith.constant 0 : index
    %1 = vector.load %arg2[%c0_1, %c0_2] : memref<32x128xf32, #tpu.memory_space<vmem>>, vector<32x128xf32>
    %cst = arith.constant dense<0.000000e+00> : vector<16x128xf32>
    %2 = tpu.matmul %0, %1, %cst {dimension_numbers = #tpu.dot_dimension_numbers<[1], [0], [0], [1], [0, 0, 1, 1], [], []>} : vector<16x32xf32>, vector<32x128xf32>, vector<16x128xf32> -> vector<16x128xf32>
    %c0_3 = arith.constant 0 : index
    %c0_4 = arith.constant 0 : index
    %3 = vector.load %arg3[%c0_3, %c0_4] : memref<1x128xf32, #tpu.memory_space<vmem>>, vector<1x128xf32>
    %4 = vector.broadcast %3 : vector<1x128xf32> to vector<16x128xf32>
    %5 = arith.addf %2, %4 : vector<16x128xf32>
    %6 = math.tanh %5 : vector<16x128xf32>
    %cst_5 = arith.constant 5.000000e-01 : f32
    %7 = vector.broadcast %cst_5 : f32 to vector<16x128xf32>
    %8 = arith.mulf %6, %7 : vector<16x128xf32>
    %cst_6 = arith.constant 5.000000e-01 : f32
    %9 = vector.broadcast %cst_6 : f32 to vector<16x128xf32>
    %10 = arith.addf %8, %9 : vector<16x128xf32>
    %c0_7 = arith.constant 0 : index
    %c0_8 = arith.constant 0 : index
    %11 = vector.load %arg4[%c0_7, %c0_8] : memref<16x128xf32, #tpu.memory_space<vmem>>, vector<16x128xf32>
    tpu.vector_store %arg4[%c0_7, %c0_8], %10 {strides = array<i32>} : memref<16x128xf32, #tpu.memory_space<vmem>>, vector<16x128xf32>,
    return
  }
  func.func @transform_0(%arg0: i32) -> (i32, i32) {
    %c0_i32 = arith.constant 0 : i32
    %c0_i32_0 = arith.constant 0 : i32
    return %arg0, %c0_i32 : i32, i32
  }
  func.func @transform_1(%arg0: i32) -> (i32, i32) {
    %c0_i32 = arith.constant 0 : i32
    %c0_i32_0 = arith.constant 0 : i32
    %c0_i32_1 = arith.constant 0 : i32
    return %c0_i32, %c0_i32_0 : i32, i32
  }
  func.func @transform_2(%arg0: i32) -> (i32, i32) {
    %c0_i32 = arith.constant 0 : i32
    %c0_i32_0 = arith.constant 0 : i32
    %c0_i32_1 = arith.constant 0 : i32
    return %c0_i32, %c0_i32_0 : i32, i32
  }
  func.func @transform_3(%arg0: i32) -> (i32, i32) {
    %c0_i32 = arith.constant 0 : i32
    %c0_i32_0 = arith.constant 0 : i32
    return %arg0, %c0_i32 : i32, i32
  }
}

</mosaic_0001>

<bundles_post_ra>
// kernel: tpu_custom_call.1
= control target key start
LH: loop header
LB: loop body
LE: loop exit
PB: predicated region body
PF: predicated region fallthrough
CT: control target
= control target key end

     0   :  { %8 = vsyncpa [#allocation3], 0  ;;  %s346_s0 = inlined_call_operand.hbm [shape: f32[16,32], index: 0, kind: input, shape index: {}]   ;;  %s347_s1 = inlined_call_operand.hbm [shape: f32[32,128], index: 1, kind: input, shape index: {}]   ;;  %s348_s2 = inlined_call_operand.vmem [shape: f32[1,128], index: 2, kind: input, shape index: {}]   ;;  %s349_s3 = inlined_call_operand.hbm [shape: f32[16,128], index: 3, kind: output, shape index: {}]  }
   0x1   :  { %9 = vsyncpa [#allocation6], 0 }
   0x2   :  { %10 = vsyncpa [#allocation4], 0  ;;  %s273_s12 = smov [#allocation2]   ;;  %s201_s16 = scalar_lea.hbm %s346_s0, 256 }
   0x3   :  { %s16_s13 = sshll.u32 %s273_s12, 4  ;;  %p202_p0 = scmp.ne.s32.totalorder %s346_s0, %s201_s16  ;;  %s17_s13 = int_to_ptr.vmem [resolvable:$true] %s16_s13 }
   0x4   :  { %p205_p1 = scmp.lt.u32.totalorder %s201_s16, %s346_s0 }
   0x6   :  { %p207_p2 = pnand %p205_p1, %p202_p0 }
   0x8   :  { %210 = shalt.err (!%p207_p2)
}
   0x9   :  { %s211_s21 = scalar_lea.vmem %s17_s13, 256  ;;  %p216_p4 = scmp.lt.s32.totalorder %s17_s13, %s17_s13 }
   0xa   :  { %p212_p3 = scmp.ne.s32.totalorder %s17_s13, %s211_s21  ;;  %p217_p5 = scmp.lt.s32.totalorder %s211_s21, %s211_s21 }
   0xc   :  { %p218_p6 = por %p217_p5, %p216_p4 }
   0xe   :  { %p219_p7 = pnand %p218_p6, %p212_p3 }
  0x10   :  { %222 = shalt.err (!%p219_p7)
}
  0x11   :  { %s274_s22 = smov 128   ;;  %s275_s23 = smov 8  }
  0x12   :  { %22 = dma.hbm_to_vmem [thread:$0]  %s346_s0, 256, %s17_s13, [#allocation3], %s274_s22, %s274_s22, %s275_s23  }
  0x13   :  { %s276_s26 = smov [#allocation5]   ;;  %s223_s30 = scalar_lea.hbm %s347_s1, 512 }
  0x14   :  { %s28_s27 = sshll.u32 %s276_s26, 4  ;;  %p224_p8 = scmp.ne.s32.totalorder %s347_s1, %s223_s30  ;;  %s29_s27 = int_to_ptr.vmem [resolvable:$true] %s28_s27 }
  0x15   :  { %p227_p9 = scmp.lt.u32.totalorder %s223_s30, %s347_s1 }
  0x17   :  { %p229_p10 = pnand %p227_p9, %p224_p8 }
  0x19   :  { %232 = shalt.err (!%p229_p10)
}
  0x1a   :  { %s233_s8 = scalar_lea.vmem %s29_s27, 512  ;;  %p238_p12 = scmp.lt.s32.totalorder %s29_s27, %s29_s27 }
  0x1b   :  { %p234_p11 = scmp.ne.s32.totalorder %s29_s27, %s233_s8  ;;  %p239_p13 = scmp.lt.s32.totalorder %s233_s8, %s233_s8 }
  0x1d   :  { %p240_p0 = por %p239_p13, %p238_p12 }
  0x1f   :  { %p241_p1 = pnand %p240_p0, %p234_p11 }
  0x21   :  { %244 = shalt.err (!%p241_p1)
}
  0x22   :  { %34 = dma.hbm_to_vmem [thread:$0]  %s347_s1, 512, %s29_s27, [#allocation6], %s274_s22, %s274_s22, %s275_s23  }
  0x23   :  { %267 = dma.done.wait [#allocation3], 256  }
  0x24   :  { %268 = vsyncadd [#allocation3], 4294967040 }
  0x25   :  { %269 = dma.done.wait [#allocation6], 512  }
  0x26   :  { %270 = vsyncadd [#allocation6], 4294966784  ;;  %vm56_vm0 = vcmask 261120   ;;  %v45_v0 = vld [vmem:[#allocation5] sm:$0xff]  ;;  %v46_v1 = vld [vmem:[#allocation5 + $0x8] sm:$0xff]  ;;  %s277_s11 = smov [#allocation7]  }
  0x27   :  { %v47_v2 = vld [vmem:[#allocation5 + $0x10] sm:$0xff]  ;;  %v184_v3 = vpack.c.bf16 %v46_v1, %v45_v0  ;;  %v48_v4 = vld [vmem:[#allocation5 + $0x18] sm:$0xff]  ;;  %s151_s12 = sshll.u32 %s277_s11, 4  ;;  %s152_s12 = int_to_ptr.vmem [resolvable:$true] %s151_s12 }
  0x28   :  { %v43_v5 = vld [vmem:[#allocation2] sm:$0xff]  ;;  %v188_v6 = vpack.c.bf16 %v48_v4, %v47_v2  ;;  %v44_v7 = vld [vmem:[#allocation2 + $0x8] sm:$0xff]  ;;  %s245_s13 = scalar_lea.vmem %s152_s12, 256  ;;  %p250_p3 = scmp.lt.s32.totalorder %s152_s12, %s152_s12 }
  0x29   :  { %181 = vmatprep.mubr.msk.f32.mxu0 %vm56_vm0, %v43_v5  ;;  %185 = vmatprep.subr.bf16.mxu0 %v184_v3  ;;  %v164_v8 = vld [vmem:[%s348_s2] ss:$0 sm:$0xff]  ;;  %p246_p2 = scmp.ne.s32.totalorder %s152_s12, %s245_s13  ;;  %p251_p4 = scmp.lt.s32.totalorder %s245_s13, %s245_s13 }
  0x2a   :  { %187 = vmatpush3.bf16.msra.mxu0 %v184_v3 }
  0x2b   :  { %189 = vmatprep.subr.bf16.mxu0 %v188_v6  ;;  %p252_p5 = por %p251_p4, %p250_p3 }
  0x2d   :  { %p253_p6 = pnand %p252_p5, %p246_p2 }
  0x2e   :  { %191 = vmatpush3.bf16.msra.mxu0 %v188_v6 }
  0x31   :  { %182 = vmatmul.mubr.msk.f32.vlgmr.msra.gmra.mrb[0].mxu0 %vm56_vm0, %v44_v7 }
 0x104   :  { %v183_v9 = vpop.f32.mrb[0].mxu0 }
 0x105   :  { %v135_v10 = vadd.f32 %v183_v9, %v164_v8  ;;  %v129_v11 = vpop.f32.mrb[1].mxu0 }
 0x106   :  { %v130_v12 = vadd.f32 %v164_v8, %v129_v11 }
 0x107   :  { %197 = vtanh.f32 %v135_v10 }
 0x108   :  { %199 = vtanh.f32 %v130_v12 }
 0x111   :  { %v198_v13 = vpop.eup %197 }
 0x112   :  { %v200_v14 = vpop.eup %199  ;;  %v141_v15 = vmul.f32 0.5, %v198_v13 }
 0x113   :  { %v140_v16 = vmul.f32 0.5, %v200_v14 }
 0x114   :  { %v143_v17 = vadd.f32 0.5, %v141_v15 }
 0x115   :  { %v142_v18 = vadd.f32 0.5, %v140_v16 }
 0x116   :  { %145 = vst [vmem:[#allocation7 + $0x8] sm:$0xff] %v143_v17 }
 0x117   :  { %144 = vst [vmem:[#allocation7] sm:$0xff] %v142_v18 }
 0x118   :  { %256 = shalt.err (!%p253_p6)
}
 0x119   :  { %s257_s15 = scalar_lea.hbm %s349_s3, 256 }
 0x11a   :  { %p258_p7 = scmp.ne.s32.totalorder %s349_s3, %s257_s15  ;;  %p261_p8 = scmp.lt.u32.totalorder %s257_s15, %s349_s3 }
 0x11c   :  { %p263_p9 = pnand %p261_p8, %p258_p7 }
 0x11e   :  { %266 = shalt.err (!%p263_p9)
}
 0x11f   :  { %157 = dma.vmem_to_hbm [thread:$0]  %s152_s12, 256, %s349_s3, [#allocation4], %s274_s22, %s274_s22, %s275_s23  }
 0x120   :  { %271 = dma.done.wait [#allocation4], 256  }
 0x121   :  { %272 = vsyncadd [#allocation4], 4294967040 }
 0x122   :  { %161 = vsyncpa [#allocation3], 1 }
 0x123   :  { %162 = vsyncpa [#allocation6], 1 }
 0x124   :  { %163 = vsyncpa [#allocation4], 1 }

</bundles_post_ra>
